<compile_context>
chip_gen: v6e
topology: v6e:2x2x1
jax: 0.10.0
libtpu: 0.0.40
codegen_flags: <defaults>
</compile_context>

<pallas_src>
import functools

import jax
import jax.numpy as jnp
from jax.experimental import pallas as pl
from jax.experimental.pallas import tpu as pltpu


# ---------------------------------------------------------------------------
# Pallas kernel: fused 3-layer MNF-DQN forward
# ---------------------------------------------------------------------------
def _make_kernel(a_valid):
    """a_valid = number of real action columns of the (padded) final layer."""

    def _layer(h, z, eps, w_ref):
        # One MXU pass per layer: [h*z | h*h | 1] @ [[W_mu, 0], [0, W_var], [b_mu, b_var]]
        w = w_ref[...]
        out_pad = w.shape[1] // 2
        ones = jnp.ones((h.shape[0], 1), dtype=h.dtype)
        lhs = jnp.concatenate([h * z, h * h, ones], axis=-1)      # (tb, 2K+1)
        res = jnp.dot(lhs.astype(w.dtype), w,
                      preferred_element_type=jnp.float32)          # (tb, 2*out_pad)
        mu = res[:, :out_pad]
        # max() guard keeps padded / stale tail-block rows deterministic (sqrt>=0).
        var = jnp.maximum(res[:, out_pad:], 0.0)
        if eps.shape[1] < out_pad:                                  # final padded layer
            eps = jnp.concatenate(
                [eps, jnp.zeros((eps.shape[0], out_pad - eps.shape[1]), eps.dtype)],
                axis=-1)
        # NOTE: a packed-res epilogue (sqrt on the full (tb,2N) vreg + XLU roll)
        # was considered but skipped: at these widths the kernel is launch-bound
        # and the roll variant needs eps pre-aligned to the var lanes.
        return mu + jnp.sqrt(var) * eps

    def kernel(x_ref, z1_ref, z2_ref, z3_ref, e1_ref, e2_ref, e3_ref,
               w1_ref, w2_ref, w3_ref, o_ref):
        x = x_ref[...]
        h1 = jnp.maximum(_layer(x, z1_ref[...], e1_ref[...], w1_ref), 0.0)
        h2 = jnp.maximum(_layer(h1, z2_ref[...], e2_ref[...], w2_ref), 0.0)
        o_ref[...] = _layer(h2, z3_ref[...], e3_ref[...], w3_ref)

    del a_valid  # padding handled via eps width; kept for interface clarity
    return kernel


def _default_batch_tile(batch):
    """Generation-aware batch tile.

    * Single grid step on single-TensorCore chips (v2-v6e) and for small B.
    * On multi-TC v7x, split into exactly 2 'parallel' steps only when each
      core gets >= 128 rows.
    * Cap tb at 256 on v5e for very large batches (single vector-store slot).
    """
    try:
        kind = jax.devices()[0].device_kind.lower()
    except Exception:  # pragma: no cover - defensive (e.g. odd backends)
        kind = ""
    if "v7" in kind and batch >= 256:
        return pl.cdiv(batch, 2)
    if ("v5 lite" in kind or "v5e" in kind) and batch > 256:
        return 256
    return batch


def mnf_dqn_forward(x, packed_ws, zs, eps, num_actions, *, tb=None):
    """Fused MNF-DQN forward.

    packed_ws : 3 buffers from pack_mnf_layer (block-diag W_mu/W_var + bias row)
    zs        : per-layer multiplicative noise [(B,d1), (B,d2), (B,d3)]
    eps       : per-layer output noise [(B,d2), (B,d3), (B,A)]
    Returns (B, num_actions).

    The matmul runs in the packed buffers' dtype: pack in bf16 for realistic
    (512-1024 wide) layers to halve weight DMA bytes; default packing is f32
    because exp(2*W_logstd) variance weights (~1e-5) lose ~0.4% in bf16.
    """
    B, d1 = x.shape
    d2 = packed_ws[0].shape[1] // 2
    d3 = packed_ws[1].shape[1] // 2
    a_pad = packed_ws[2].shape[1] // 2
    assert packed_ws[0].shape[0] == 2 * d1 + 1
    assert packed_ws[1].shape[0] == 2 * d2 + 1
    assert packed_ws[2].shape[0] == 2 * d3 + 1
    assert num_actions <= a_pad
    assert zs[0].shape == (B, d1) and zs[1].shape == (B, d2) and zs[2].shape == (B, d3)
    assert eps[0].shape == (B, d2) and eps[1].shape == (B, d3)
    assert eps[2].shape == (B, num_actions)

    if tb is None:
        tb = _default_batch_tile(B)
    tb = min(tb, B)

    kernel = _make_kernel(num_actions)

    # TODO(synk): at realistic widths on v7x, add pipeline_mode=pl.Buffered(1)
    # to the three grid-invariant weight specs (plus bf16 packing) to stay
    # inside the 32 MiB default scoped VMEM without raising vmem_limit_bytes.
    out = pl.pallas_call(
        kernel,
        out_shape=jax.ShapeDtypeStruct((B, a_pad), jnp.float32),
        grid=(pl.cdiv(B, tb),),
        in_specs=[
            pl.BlockSpec((tb, d1), lambda i: (i, 0)),              # x
            pl.BlockSpec((tb, d1), lambda i: (i, 0)),              # z1
            pl.BlockSpec((tb, d2), lambda i: (i, 0)),              # z2
            pl.BlockSpec((tb, d3), lambda i: (i, 0)),              # z3
            pl.BlockSpec((tb, d2), lambda i: (i, 0)),              # e1
            pl.BlockSpec((tb, d3), lambda i: (i, 0)),              # e2
            pl.BlockSpec((tb, num_actions), lambda i: (i, 0)),     # e3
            pl.BlockSpec(packed_ws[0].shape, lambda i: (0, 0)),    # fc1 packed
            pl.BlockSpec(packed_ws[1].shape, lambda i: (0, 0)),    # fc2 packed
            pl.BlockSpec(packed_ws[2].shape, lambda i: (0, 0)),    # fc3 packed
        ],
        out_specs=pl.BlockSpec((tb, a_pad), lambda i: (i, 0)),
        compiler_params=pltpu.CompilerParams(
            dimension_semantics=("parallel",)),
    )(x, zs[0], zs[1], zs[2], eps[0], eps[1], eps[2], *packed_ws)
    return out[:, :num_actions]


# ---------------------------------------------------------------------------
# Parameter packing (done once, outside the hot path)
# ---------------------------------------------------------------------------
def pack_mnf_layer(layer, n_pad=None, dtype=jnp.float32):
    """Pack one MNFLinear into a (2K+1, 2N) buffer:
         rows [0,K)   cols [0,out)          : W_mu.T
         rows [K,2K)  cols [n_pad,n_pad+out): exp(2*W_logstd).T
         row  2K                            : [b_mu | exp(b_logvar)]  (bias row)
    n_pad pads the output lanes (use 128 for the final layer -> lane-dense store).
    dtype is the MXU operand dtype (f32 default; bf16 for large widths).

    NOTE: exp(2*W_logstd) / exp(b_logvar) are baked in here; if the parameters
    are ever trained, re-run this packing after each update.
    """
    w_mu = layer["w_mu"]                      # (out, in), torch layout
    out_f, in_f = w_mu.shape
    if n_pad is None:
        n_pad = out_f
    w_var = jnp.exp(2.0 * layer["w_logstd"])  # (out, in)
    wp = jnp.zeros((2 * in_f + 1, 2 * n_pad), jnp.float32)
    wp = wp.at[:in_f, :out_f].set(w_mu.T)
    wp = wp.at[in_f:2 * in_f, n_pad:n_pad + out_f].set(w_var.T)
    wp = wp.at[2 * in_f, :out_f].set(layer["b_mu"])
    wp = wp.at[2 * in_f, n_pad:n_pad + out_f].set(jnp.exp(layer["b_logvar"]))
    return wp.astype(dtype)


# ---------------------------------------------------------------------------
# Glue: masked RealNVP q-flow, z sampling, deterministic parameter init
# ---------------------------------------------------------------------------
def masked_nvp_flow(z, flow_steps):
    for step in flow_steps:
        mask = step["mask"]
        h = jnp.tanh((z * mask) @ step["w0"] + step["b0"])
        for wl, bl in step["hidden"]:
            h = jnp.tanh(h @ wl + bl)
        mu = h @ step["wm"] + step["bm"]
        sigma = jax.nn.sigmoid(h @ step["ws"] + step["bs"])
        z = mask * z + (1.0 - mask) * (z * sigma + (1.0 - sigma) * mu)
    return z


def sample_z(key, layer, batch):
    dim = layer["qzero_mean"].shape[0]
    eps = jax.random.normal(key, (batch, dim), dtype=jnp.float32)
    z0 = layer["qzero_mean"] + jnp.exp(0.5 * layer["qzero_logvar"]) * eps
    return masked_nvp_flow(z0, layer["flow_q"])


def mnf_dqn_apply(x, packed_ws, layers, key, *, num_actions):
    """Whole forward (flow z-sampling + eps sampling + fused Pallas kernel).

    Jit this function: the ~18 tiny flow matmuls and the noise generation then
    live in the same XLA executable as the Pallas call (one dispatch), which
    was the dominant end-to-end cost at small batch.
    """
    # TODO(synk): the masked-RealNVP flow itself is still plain-JAX (fused by
    # XLA under this jit), not folded into the Pallas kernel.
    B = x.shape[0]
    kz = jax.random.split(key, 6)
    zs = [sample_z(kz[i], layers[i], B) for i in range(3)]
    out_dims = (packed_ws[0].shape[1] // 2, packed_ws[1].shape[1] // 2, num_actions)
    eps = [jax.random.normal(kz[3 + i], (B, out_dims[i]), dtype=jnp.float32)
           for i in range(3)]
    return mnf_dqn_forward(x, packed_ws, zs, eps, num_actions)


def init_mnf_linear(key, in_f, out_f, hidden_dim, n_hidden, n_flows_q):
    keys = jax.random.split(key, 64)
    ki = iter(range(64))

    def nk():
        return keys[next(ki)]

    std = float(in_f) ** -0.5
    w_mu = jax.random.normal(nk(), (out_f, in_f), dtype=jnp.float32) * std
    w_logstd = (jnp.full((out_f, in_f), -5.0, jnp.float32)
                + 0.01 * jax.random.normal(nk(), (out_f, in_f), dtype=jnp.float32))
    b_mu = jnp.zeros((out_f,), jnp.float32)
    b_logvar = jnp.full((out_f,), -5.0, jnp.float32)
    qzero_mean = 1.0 + 0.1 * jax.random.normal(nk(), (in_f,), dtype=jnp.float32)
    qzero_logvar = jnp.full((in_f,), -5.0, jnp.float32)

    flow_q = []
    for f in range(n_flows_q):
        mask = (jnp.arange(in_f) % 2 == f % 2).astype(jnp.float32)
        w0 = jax.random.normal(nk(), (in_f, hidden_dim), dtype=jnp.float32) * (float(in_f) ** -0.5)
        b0 = jnp.zeros((hidden_dim,), jnp.float32)
        hidden = []
        for _ in range(n_hidden - 1):
            wl = jax.random.normal(nk(), (hidden_dim, hidden_dim), dtype=jnp.float32) * (float(hidden_dim) ** -0.5)
            hidden.append((wl, jnp.zeros((hidden_dim,), jnp.float32)))
        wm = jax.random.normal(nk(), (hidden_dim, in_f), dtype=jnp.float32) * (float(hidden_dim) ** -0.5)
        ws = jax.random.normal(nk(), (hidden_dim, in_f), dtype=jnp.float32) * (float(hidden_dim) ** -0.5)
        flow_q.append(dict(mask=mask, w0=w0, b0=b0, hidden=hidden,
                           wm=wm, bm=jnp.zeros((in_f,), jnp.float32),
                           ws=ws, bs=jnp.zeros((in_f,), jnp.float32)))

    # TODO(synk): r-flow (n_flows_r) and rzero_{c,b1,b2} params only enter kldiv(),
    # not the forward pass, so they are omitted here.
    return dict(
        w_mu=w_mu,                 # (out, in) torch layout
        w_logstd=w_logstd,
        b_mu=b_mu,
        b_logvar=b_logvar,
        qzero_mean=qzero_mean,
        qzero_logvar=qzero_logvar,
        flow_q=flow_q,
    )


def reference_forward(x, layers, zs, eps):
    def layer(h, L, z, e):
        mu = (h * z) @ L["w_mu"].T + L["b_mu"]
        var = (h * h) @ jnp.exp(2.0 * L["w_logstd"]).T + jnp.exp(L["b_logvar"])
        return mu + jnp.sqrt(var) * e
    h1 = jax.nn.relu(layer(x, layers[0], zs[0], eps[0]))
    h2 = jax.nn.relu(layer(h1, layers[1], zs[1], eps[1]))
    return layer(h2, layers[2], zs[2], eps[2])


# ---------------------------------------------------------------------------
if __name__ == "__main__":
    # args: input_dim=32, hidden_dim=16 (flow MLP), n_hidden=1, n_flows_q=2,
    # n_flows_r=2, action_space=4; fc widths per module: input_dim->16->16->A.
    input_dim, hidden_dim, n_hidden, n_flows_q = 32, 16, 1, 2
    action_space, B = 4, 64

    key = jax.random.PRNGKey(0)
    k_x, k1, k2, k3, k_noise = jax.random.split(key, 5)

    x = jax.random.normal(k_x, (B, input_dim), dtype=jnp.float32)
    layers = [
        init_mnf_linear(k1, input_dim, 16, hidden_dim, n_hidden, n_flows_q),
        init_mnf_linear(k2, 16, 16, hidden_dim, n_hidden, n_flows_q),
        init_mnf_linear(k3, 16, action_space, hidden_dim, n_hidden, n_flows_q),
    ]

    # Pack once: block-diag [W_mu, W_var] + folded bias row; final layer padded
    # to 128 output lanes for a lane-dense store.  (f32 packing -> exact path.)
    packed = [pack_mnf_layer(layers[0]),
              pack_mnf_layer(layers[1]),
              pack_mnf_layer(layers[2], n_pad=128)]

    # Whole forward (flow + noise + fused kernel) under one jit; batch tile is
    # picked per-generation inside (single grid step here).
    fwd = jax.jit(mnf_dqn_apply, static_argnames=("num_actions",))
    out = fwd(x, packed, layers, k_noise, num_actions=action_space)
    out = jax.block_until_ready(out)

    # Reference with identical noise (re-derived from the same key splits).
    kz = jax.random.split(k_noise, 6)
    zs = [sample_z(kz[i], layers[i], B) for i in range(3)]
    eps_dims = (16, 16, action_space)
    eps = [jax.random.normal(kz[3 + i], (B, eps_dims[i]), dtype=jnp.float32)
           for i in range(3)]
    ref = reference_forward(x, layers, zs, eps)

    assert out.shape == (B, action_space)
    max_err = float(jnp.max(jnp.abs(out - ref)))
    assert jnp.allclose(out, ref, atol=1e-4, rtol=1e-4), max_err
    print("KERNEL_OK")
</pallas_src>

<mosaic_0001>
module attributes {stable_mosaic.version = 11 : i64} {
  func.func @kernel(%arg0: i32, %arg1: memref<64x32xf32, #tpu.memory_space<vmem>>, %arg2: memref<64x32xf32, #tpu.memory_space<vmem>>, %arg3: memref<64x16xf32, #tpu.memory_space<vmem>>, %arg4: memref<64x16xf32, #tpu.memory_space<vmem>>, %arg5: memref<64x16xf32, #tpu.memory_space<vmem>>, %arg6: memref<64x16xf32, #tpu.memory_space<vmem>>, %arg7: memref<64x4xf32, #tpu.memory_space<vmem>>, %arg8: memref<65x32xf32, #tpu.memory_space<vmem>>, %arg9: memref<33x32xf32, #tpu.memory_space<vmem>>, %arg10: memref<33x256xf32, #tpu.memory_space<vmem>>, %arg11: memref<64x128xf32, #tpu.memory_space<vmem>>) attributes {dimension_semantics = [#tpu.dimension_semantics<parallel>], iteration_bounds = array<i64: 1>, scalar_prefetch = 0 : i64, scratch_operands = 0 : i64, tpu.core_type = #tpu.core_type<tc>, window_params = [{transform_indices = @transform_0, window_bounds = array<i64: 64, 32>}, {transform_indices = @transform_1, window_bounds = array<i64: 64, 32>}, {transform_indices = @transform_2, window_bounds = array<i64: 64, 16>}, {transform_indices = @transform_3, window_bounds = array<i64: 64, 16>}, {transform_indices = @transform_4, window_bounds = array<i64: 64, 16>}, {transform_indices = @transform_5, window_bounds = array<i64: 64, 16>}, {transform_indices = @transform_6, window_bounds = array<i64: 64, 4>}, {pipeline_mode = #tpu.pipeline_mode<synchronous>, transform_indices = @transform_7, window_bounds = array<i64: 65, 32>}, {pipeline_mode = #tpu.pipeline_mode<synchronous>, transform_indices = @transform_8, window_bounds = array<i64: 33, 32>}, {pipeline_mode = #tpu.pipeline_mode<synchronous>, transform_indices = @transform_9, window_bounds = array<i64: 33, 256>}, {transform_indices = @transform_10, window_bounds = array<i64: 64, 128>}]} {
    %c0 = arith.constant 0 : index
    %c0_0 = arith.constant 0 : index
    %0 = vector.load %arg1[%c0, %c0_0] : memref<64x32xf32, #tpu.memory_space<vmem>>, vector<64x32xf32>
    %c0_1 = arith.constant 0 : index
    %c0_2 = arith.constant 0 : index
    %1 = vector.load %arg2[%c0_1, %c0_2] : memref<64x32xf32, #tpu.memory_space<vmem>>, vector<64x32xf32>
    %c0_3 = arith.constant 0 : index
    %c0_4 = arith.constant 0 : index
    %2 = vector.load %arg5[%c0_3, %c0_4] : memref<64x16xf32, #tpu.memory_space<vmem>>, vector<64x16xf32>
    %c0_5 = arith.constant 0 : index
    %c0_6 = arith.constant 0 : index
    %3 = vector.load %arg8[%c0_5, %c0_6] : memref<65x32xf32, #tpu.memory_space<vmem>>, vector<65x32xf32>
    %cst = arith.constant 1.000000e+00 : f32
    %4 = vector.broadcast %cst : f32 to vector<64x1xf32>
    %5 = arith.mulf %0, %1 : vector<64x32xf32>
    %6 = arith.mulf %0, %0 : vector<64x32xf32>
    %7 = tpu.concatenate %5, %6, %4 in 1 : vector<64x32xf32>, vector<64x32xf32>, vector<64x1xf32> -> vector<64x65xf32>
    %cst_7 = arith.constant dense<0.000000e+00> : vector<64x32xf32>
    %8 = tpu.matmul %7, %3, %cst_7 {dimension_numbers = #tpu.dot_dimension_numbers<[1], [0], [0], [1], [0, 0, 1, 1], [], []>} : vector<64x65xf32>, vector<65x32xf32>, vector<64x32xf32> -> vector<64x32xf32>
    %9 = vector.extract_strided_slice %8 {offsets = [0, 0], sizes = [64, 16], strides = [1, 1]} : vector<64x32xf32> to vector<64x16xf32>
    %10 = vector.extract_strided_slice %8 {offsets = [0, 16], sizes = [64, 16], strides = [1, 1]} : vector<64x32xf32> to vector<64x16xf32>
    %cst_8 = arith.constant 0.000000e+00 : f32
    %11 = vector.broadcast %cst_8 : f32 to vector<64x16xf32>
    %12 = arith.maximumf %10, %11 : vector<64x16xf32>
    %13 = math.sqrt %12 : vector<64x16xf32>
    %14 = arith.mulf %13, %2 : vector<64x16xf32>
    %15 = arith.addf %9, %14 : vector<64x16xf32>
    %cst_9 = arith.constant 0.000000e+00 : f32
    %16 = vector.broadcast %cst_9 : f32 to vector<64x16xf32>
    %17 = arith.maximumf %15, %16 : vector<64x16xf32>
    %c0_10 = arith.constant 0 : index
    %c0_11 = arith.constant 0 : index
    %18 = vector.load %arg3[%c0_10, %c0_11] : memref<64x16xf32, #tpu.memory_space<vmem>>, vector<64x16xf32>
    %c0_12 = arith.constant 0 : index
    %c0_13 = arith.constant 0 : index
    %19 = vector.load %arg6[%c0_12, %c0_13] : memref<64x16xf32, #tpu.memory_space<vmem>>, vector<64x16xf32>
    %c0_14 = arith.constant 0 : index
    %c0_15 = arith.constant 0 : index
    %20 = vector.load %arg9[%c0_14, %c0_15] : memref<33x32xf32, #tpu.memory_space<vmem>>, vector<33x32xf32>
    %cst_16 = arith.constant 1.000000e+00 : f32
    %21 = vector.broadcast %cst_16 : f32 to vector<64x1xf32>
    %22 = arith.mulf %17, %18 : vector<64x16xf32>
    %23 = arith.mulf %17, %17 : vector<64x16xf32>
    %24 = tpu.concatenate %22, %23, %21 in 1 : vector<64x16xf32>, vector<64x16xf32>, vector<64x1xf32> -> vector<64x33xf32>
    %cst_17 = arith.constant dense<0.000000e+00> : vector<64x32xf32>
    %25 = tpu.matmul %24, %20, %cst_17 {dimension_numbers = #tpu.dot_dimension_numbers<[1], [0], [0], [1], [0, 0, 1, 1], [], []>} : vector<64x33xf32>, vector<33x32xf32>, vector<64x32xf32> -> vector<64x32xf32>
    %26 = vector.extract_strided_slice %25 {offsets = [0, 0], sizes = [64, 16], strides = [1, 1]} : vector<64x32xf32> to vector<64x16xf32>
    %27 = vector.extract_strided_slice %25 {offsets = [0, 16], sizes = [64, 16], strides = [1, 1]} : vector<64x32xf32> to vector<64x16xf32>
    %cst_18 = arith.constant 0.000000e+00 : f32
    %28 = vector.broadcast %cst_18 : f32 to vector<64x16xf32>
    %29 = arith.maximumf %27, %28 : vector<64x16xf32>
    %30 = math.sqrt %29 : vector<64x16xf32>
    %31 = arith.mulf %30, %19 : vector<64x16xf32>
    %32 = arith.addf %26, %31 : vector<64x16xf32>
    %cst_19 = arith.constant 0.000000e+00 : f32
    %33 = vector.broadcast %cst_19 : f32 to vector<64x16xf32>
    %34 = arith.maximumf %32, %33 : vector<64x16xf32>
    %c0_20 = arith.constant 0 : index
    %c0_21 = arith.constant 0 : index
    %35 = vector.load %arg4[%c0_20, %c0_21] : memref<64x16xf32, #tpu.memory_space<vmem>>, vector<64x16xf32>
    %c0_22 = arith.constant 0 : index
    %c0_23 = arith.constant 0 : index
    %36 = vector.load %arg7[%c0_22, %c0_23] : memref<64x4xf32, #tpu.memory_space<vmem>>, vector<64x4xf32>
    %c0_24 = arith.constant 0 : index
    %c0_25 = arith.constant 0 : index
    %37 = vector.load %arg10[%c0_24, %c0_25] : memref<33x256xf32, #tpu.memory_space<vmem>>, vector<33x256xf32>
    %cst_26 = arith.constant 1.000000e+00 : f32
    %38 = vector.broadcast %cst_26 : f32 to vector<64x1xf32>
    %39 = arith.mulf %34, %35 : vector<64x16xf32>
    %40 = arith.mulf %34, %34 : vector<64x16xf32>
    %41 = tpu.concatenate %39, %40, %38 in 1 : vector<64x16xf32>, vector<64x16xf32>, vector<64x1xf32> -> vector<64x33xf32>
    %cst_27 = arith.constant dense<0.000000e+00> : vector<64x256xf32>
    %42 = tpu.matmul %41, %37, %cst_27 {dimension_numbers = #tpu.dot_dimension_numbers<[1], [0], [0], [1], [0, 0, 1, 1], [], []>} : vector<64x33xf32>, vector<33x256xf32>, vector<64x256xf32> -> vector<64x256xf32>
    %43 = vector.extract_strided_slice %42 {offsets = [0, 0], sizes = [64, 128], strides = [1, 1]} : vector<64x256xf32> to vector<64x128xf32>
    %44 = vector.extract_strided_slice %42 {offsets = [0, 128], sizes = [64, 128], strides = [1, 1]} : vector<64x256xf32> to vector<64x128xf32>
    %cst_28 = arith.constant 0.000000e+00 : f32
    %45 = vector.broadcast %cst_28 : f32 to vector<64x128xf32>
    %46 = arith.maximumf %44, %45 : vector<64x128xf32>
    %cst_29 = arith.constant 0.000000e+00 : f32
    %47 = vector.broadcast %cst_29 : f32 to vector<64x124xf32>
    %48 = tpu.concatenate %36, %47 in 1 : vector<64x4xf32>, vector<64x124xf32> -> vector<64x128xf32>
    %49 = math.sqrt %46 : vector<64x128xf32>
    %50 = arith.mulf %49, %48 : vector<64x128xf32>
    %51 = arith.addf %43, %50 : vector<64x128xf32>
    %c0_30 = arith.constant 0 : index
    %c0_31 = arith.constant 0 : index
    %52 = vector.load %arg11[%c0_30, %c0_31] : memref<64x128xf32, #tpu.memory_space<vmem>>, vector<64x128xf32>
    tpu.vector_store %arg11[%c0_30, %c0_31], %51 {strides = array<i32>} : memref<64x128xf32, #tpu.memory_space<vmem>>, vector<64x128xf32>,
    return
  }
  func.func @transform_0(%arg0: i32) -> (i32, i32) {
    %c0_i32 = arith.constant 0 : i32
    %c0_i32_0 = arith.constant 0 : i32
    return %arg0, %c0_i32 : i32, i32
  }
  func.func @transform_1(%arg0: i32) -> (i32, i32) {
    %c0_i32 = arith.constant 0 : i32
    %c0_i32_0 = arith.constant 0 : i32
    return %arg0, %c0_i32 : i32, i32
  }
  func.func @transform_2(%arg0: i32) -> (i32, i32) {
    %c0_i32 = arith.constant 0 : i32
    %c0_i32_0 = arith.constant 0 : i32
    return %arg0, %c0_i32 : i32, i32
  }
  func.func @transform_3(%arg0: i32) -> (i32, i32) {
    %c0_i32 = arith.constant 0 : i32
    %c0_i32_0 = arith.constant 0 : i32
    return %arg0, %c0_i32 : i32, i32
  }
  func.func @transform_4(%arg0: i32) -> (i32, i32) {
    %c0_i32 = arith.constant 0 : i32
    %c0_i32_0 = arith.constant 0 : i32
    return %arg0, %c0_i32 : i32, i32
  }
  func.func @transform_5(%arg0: i32) -> (i32, i32) {
    %c0_i32 = arith.constant 0 : i32
    %c0_i32_0 = arith.constant 0 : i32
    return %arg0, %c0_i32 : i32, i32
  }
  func.func @transform_6(%arg0: i32) -> (i32, i32) {
    %c0_i32 = arith.constant 0 : i32
    %c0_i32_0 = arith.constant 0 : i32
    return %arg0, %c0_i32 : i32, i32
  }
  func.func @transform_7(%arg0: i32) -> (i32, i32) {
    %c0_i32 = arith.constant 0 : i32
    %c0_i32_0 = arith.constant 0 : i32
    %c0_i32_1 = arith.constant 0 : i32
    return %c0_i32, %c0_i32_0 : i32, i32
  }
  func.func @transform_8(%arg0: i32) -> (i32, i32) {
    %c0_i32 = arith.constant 0 : i32
    %c0_i32_0 = arith.constant 0 : i32
    %c0_i32_1 = arith.constant 0 : i32
    return %c0_i32, %c0_i32_0 : i32, i32
  }
  func.func @transform_9(%arg0: i32) -> (i32, i32) {
    %c0_i32 = arith.constant 0 : i32
    %c0_i32_0 = arith.constant 0 : i32
    %c0_i32_1 = arith.constant 0 : i32
    return %c0_i32, %c0_i32_0 : i32, i32
  }
  func.func @transform_10(%arg0: i32) -> (i32, i32) {
    %c0_i32 = arith.constant 0 : i32
    %c0_i32_0 = arith.constant 0 : i32
    return %arg0, %c0_i32 : i32, i32
  }
}

</mosaic_0001>

<bundles_post_ra>
// kernel: mnf_dqn_apply.3
= control target key start
LH: loop header
LB: loop body
LE: loop exit
PB: predicated region body
PF: predicated region fallthrough
CT: control target
= control target key end

     0   :  { %s1297_s21 = smov 32   ;;  %vm159_vm0 = vcmask 1040384   ;;  %vm116_vm1 = vcmask 261120   ;;  %vm125_vm2 = vcmask 523264   ;;  %vm134_vm3 = vcmask 531456   ;;  %s2022_s0 = inlined_call_operand.vmem [shape: f32[64,32], index: 0, kind: input, shape index: {}]   ;;  %s2023_s7 = inlined_call_operand.vmem [shape: f32[65,32], index: 7, kind: input, shape index: {}]   ;;  %s2024_s4 = inlined_call_operand.vmem [shape: f32[64,16], index: 4, kind: input, shape index: {}]   ;;  %s2025_s1 = inlined_call_operand.vmem [shape: f32[64,32], index: 1, kind: input, shape index: {}]   ;;  %s2026_s8 = inlined_call_operand.vmem [shape: f32[33,32], index: 8, kind: input, shape index: {}]   ;;  %s2027_s5 = inlined_call_operand.vmem [shape: f32[64,16], index: 5, kind: input, shape index: {}]   ;;  %s2028_s2 = inlined_call_operand.vmem [shape: f32[64,16], index: 2, kind: input, shape index: {}]   ;;  %s2029_s9 = inlined_call_operand.vmem [shape: f32[33,256], index: 9, kind: input, shape index: {}]   ;;  %s2030_s3 = inlined_call_operand.vmem [shape: f32[64,16], index: 3, kind: input, shape index: {}]   ;;  %s2031_s6 = inlined_call_operand.vmem [shape: f32[64,4], index: 6, kind: input, shape index: {}]   ;;  %s2032_s10 = inlined_call_operand.vmem [shape: f32[64,128], index: 10, kind: output, shape index: {}]  }
   0x1   :  { %v1359_v0 = vld [vmem:[%s2022_s0] sm:$0xff]  ;;  %v1364_v1 = vld [vmem:[%s2022_s0 + $0x10] sm:$0xff]  ;;  %v1373_v4 = vld [vmem:[%s2022_s0 + $0x8] sm:$0xff] }
   0x2   :  { %v76_v2 = vmul.f32 %v1359_v0, %v1359_v0  ;;  %v78_v3 = vmul.f32 %v1364_v1, %v1364_v1  ;;  %v1378_v5 = vld [vmem:[%s2022_s0 + $0x18] sm:$0xff]  ;;  %v77_v6 = vmul.f32 %v1373_v4, %v1373_v4  ;;  %v1389_v8 = vld [vmem:[%s2022_s0 + $0x20] sm:$0xff]  ;;  %v1394_v9 = vld [vmem:[%s2022_s0 + $0x28] sm:$0xff] }
   0x3   :  { %v79_v7 = vmul.f32 %v1378_v5, %v1378_v5  ;;  %v67_v10 = vld [vmem:[%s2023_s7 + $0x40] sm:$0x1]  ;;  %v66_v11 = vld [vmem:[%s2023_s7 + $0x38] sm:$0xff]  ;;  %v80_v12 = vmul.f32 %v1389_v8, %v1389_v8  ;;  %v81_v13 = vmul.f32 %v1394_v9, %v1394_v9  ;;  %v1412_v14 = vld [vmem:[%s2022_s0 + $0x30] sm:$0xff] }
   0x4   :  { %92 = vrot.lane.b32.xlu0 %v76_v2, %s1297_s21  ;;  %96 = vrot.lane.b32.xlu1 %v78_v3, %s1297_s21  ;;  %v1417_v15 = vld [vmem:[%s2022_s0 + $0x38] sm:$0xff]  ;;  %v65_v16 = vld [vmem:[%s2023_s7 + $0x30] sm:$0xff]  ;;  %v82_v17 = vmul.f32 %v1412_v14, %v1412_v14 }
   0x5   :  { %1183 = vmatprep.subr.msk.mxu0 %vm159_vm0, %v67_v10  ;;  %v83_v18 = vmul.f32 %v1417_v15, %v1417_v15  ;;  %v64_v19 = vld [vmem:[%s2023_s7 + $0x28] sm:$0xff]  ;;  %v63_v20 = vld [vmem:[%s2023_s7 + $0x20] sm:$0xff]  ;;  %v62_v21 = vld [vmem:[%s2023_s7 + $0x18] sm:$0xff] }
   0x6   :  { %1184 = vmatpush3.msk.msra.mxu0 %vm159_vm0, %v67_v10  ;;  %v52_v22 = vld [vmem:[%s2024_s4 + $0x8] sm:$0xff]  ;;  %v51_v23 = vld [vmem:[%s2024_s4] sm:$0xff]  ;;  %v61_v24 = vld [vmem:[%s2023_s7 + $0x10] sm:$0xff] }
   0x7   :  { %1185 = vmatprep.subr.mxu0 %v66_v11  ;;  %v60_v25 = vld [vmem:[%s2023_s7 + $0x8] sm:$0xff]  ;;  %v54_v26 = vld [vmem:[%s2024_s4 + $0x18] sm:$0xff]  ;;  %v53_v27 = vld [vmem:[%s2024_s4 + $0x10] sm:$0xff] }
   0x8   :  { %94 = vrot.lane.b32.xlu0 %v77_v6, %s1297_s21  ;;  %98 = vrot.lane.b32.xlu1 %v79_v7, %s1297_s21  ;;  %v59_v28 = vld [vmem:[%s2023_s7] sm:$0xff]  ;;  %v56_v29 = vld [vmem:[%s2024_s4 + $0x28] sm:$0xff] }
   0x9   :  { %1186 = vmatpush3.msra.mxu0 %v66_v11  ;;  %v55_v30 = vld [vmem:[%s2024_s4 + $0x20] sm:$0xff]  ;;  %v58_v31 = vld [vmem:[%s2024_s4 + $0x38] sm:$0xff]  ;;  %v57_v32 = vld [vmem:[%s2024_s4 + $0x30] sm:$0xff] }
   0xa   :  { %1187 = vmatprep.subr.mxu0 %v65_v16  ;;  %v43_v33 = vld [vmem:[%s2025_s1] sm:$0xff]  ;;  %v45_v34 = vld [vmem:[%s2025_s1 + $0x10] sm:$0xff]  ;;  %v44_v37 = vld [vmem:[%s2025_s1 + $0x8] sm:$0xff] }
   0xb   :  { %1188 = vmatpush3.msra.mxu0 %v65_v16  ;;  %v68_v35 = vmul.f32 %v43_v33, %v1359_v0  ;;  %v70_v36 = vmul.f32 %v45_v34, %v1364_v1  ;;  %v46_v38 = vld [vmem:[%s2025_s1 + $0x18] sm:$0xff]  ;;  %v69_v41 = vmul.f32 %v44_v37, %v1373_v4  ;;  %v47_v43 = vld [vmem:[%s2025_s1 + $0x20] sm:$0xff]  ;;  %v48_v45 = vld [vmem:[%s2025_s1 + $0x28] sm:$0xff] }
   0xc   :  { %100 = vrot.lane.b32.xlu0 %v80_v12, %s1297_s21  ;;  %102 = vrot.lane.b32.xlu1 %v81_v13, %s1297_s21  ;;  %v71_v42 = vmul.f32 %v46_v38, %v1378_v5  ;;  %v72_v48 = vmul.f32 %v47_v43, %v1389_v8  ;;  %v73_v51 = vmul.f32 %v48_v45, %v1394_v9  ;;  %v49_v55 = vld [vmem:[%s2025_s1 + $0x30] sm:$0xff]  ;;  %v50_v56 = vld [vmem:[%s2025_s1 + $0x38] sm:$0xff]  ;;  %s1299_s1 = smov 112  }
   0xd   :  { %1189 = vmatprep.subr.mxu0 %v64_v19  ;;  %v74_v61 = vmul.f32 %v49_v55, %v1412_v14  ;;  %v75_v62 = vmul.f32 %v50_v56, %v1417_v15 }
   0xe   :  { %1190 = vmatpush3.msra.mxu0 %v64_v19 }
   0xf   :  { %1191 = vmatprep.subr.mxu0 %v63_v20 }
  0x10   :  { %104 = vrot.lane.b32.xlu0 %v82_v17, %s1297_s21  ;;  %106 = vrot.lane.b32.xlu1 %v83_v18, %s1297_s21  ;;  %s1298_s21 = smov 16  }
  0x11   :  { %1192 = vmatpush3.msra.mxu0 %v63_v20 }
  0x12   :  { %1193 = vmatprep.subr.mxu0 %v62_v21 }
  0x13   :  { %1194 = vmatpush3.msra.mxu0 %v62_v21 }
  0x14   :  { %342 = vrot.lane.b32.xlu1 %v52_v22, %s1298_s21  ;;  %340 = vrot.lane.b32.xlu0 %v51_v23, %s1298_s21 }
  0x15   :  { %1195 = vmatprep.subr.mxu0 %v61_v24 }
  0x16   :  { %1196 = vmatpush3.msra.mxu0 %v61_v24 }
  0x17   :  { %1197 = vmatprep.subr.mxu0 %v60_v25 }
  0x18   :  { %346 = vrot.lane.b32.xlu1 %v54_v26, %s1298_s21  ;;  %1198 = vmatpush3.msra.mxu0 %v60_v25 }
  0x19   :  { %344 = vrot.lane.b32.xlu0 %v53_v27, %s1298_s21  ;;  %1199 = vmatprep.subr.mxu0 %v59_v28 }
  0x1a   :  { %1200 = vmatpush3.msra.mxu0 %v59_v28 }
  0x1c   :  { %350 = vrot.lane.b32.xlu1 %v56_v29, %s1298_s21 }
  0x1d   :  { %348 = vrot.lane.b32.xlu0 %v55_v30, %s1298_s21 }
  0x20   :  { %354 = vrot.lane.b32.xlu1 %v58_v31, %s1298_s21 }
  0x21   :  { %352 = vrot.lane.b32.xlu0 %v57_v32, %s1298_s21 }
  0x76   :  { %v93_v39 = vpop.permute.xlu0 %92  ;;  %v97_v40 = vpop.permute.xlu1 %96 }
  0x77   :  { %v117_v44 = vsel %vm116_vm1, %v68_v35, %v93_v39  ;;  %v119_v47 = vsel %vm116_vm1, %v70_v36, %v97_v40 }
  0x78   :  { %v126_v46 = vsel %vm125_vm2, %v117_v44, 1.0  ;;  %v128_v52 = vsel %vm125_vm2, %v119_v47, 1.0 }
  0x79   :  { %1201 = vmatprep.mubr.msk.f32.mxu0 %vm134_vm3, %v126_v46 }
  0x7a   :  { %v95_v49 = vpop.permute.xlu0 %94  ;;  %v99_v50 = vpop.permute.xlu1 %98 }
  0x7b   :  { %v118_v53 = vsel %vm116_vm1, %v69_v41, %v95_v49  ;;  %v120_v54 = vsel %vm116_vm1, %v71_v42, %v99_v50 }
  0x7c   :  { %v127_v57 = vsel %vm125_vm2, %v118_v53, 1.0  ;;  %v129_v58 = vsel %vm125_vm2, %v120_v54, 1.0 }
  0x7d   :  { %1202 = vmatmul.mubr.msk.f32.vlgmr.msra.gmra.mxu0 %vm134_vm3, %v127_v57 }
  0x7e   :  { %1204 = vmatprep.mubr.msk.f32.mxu0 %vm134_vm3, %v128_v52  ;;  %v101_v59 = vpop.permute.xlu0 %100  ;;  %v103_v60 = vpop.permute.xlu1 %102 }
  0x7f   :  { %v121_v63 = vsel %vm116_vm1, %v72_v48, %v101_v59  ;;  %v122_v0 = vsel %vm116_vm1, %v73_v51, %v103_v60 }
  0x80   :  { %v130_v1 = vsel %vm125_vm2, %v121_v63, 1.0  ;;  %v131_v2 = vsel %vm125_vm2, %v122_v0, 1.0 }
  0x81   :  { %1205 = vmatmul.mubr.msk.f32.gmra.mxu0 %vm134_vm3, %v129_v58 }
  0x82   :  { %1207 = vmatprep.mubr.msk.f32.mxu0 %vm134_vm3, %v130_v1  ;;  %v105_v3 = vpop.permute.xlu0 %104  ;;  %v107_v4 = vpop.permute.xlu1 %106 }
  0x83   :  { %v123_v5 = vsel %vm116_vm1, %v74_v61, %v105_v3  ;;  %v124_v6 = vsel %vm116_vm1, %v75_v62, %v107_v4 }
  0x84   :  { %v132_v7 = vsel %vm125_vm2, %v123_v5, 1.0  ;;  %v133_v8 = vsel %vm125_vm2, %v124_v6, 1.0 }
  0x85   :  { %1208 = vmatmul.mubr.msk.f32.gmra.mxu0 %vm134_vm3, %v131_v2 }
  0x86   :  { %1210 = vmatprep.mubr.msk.f32.mxu0 %vm134_vm3, %v132_v7  ;;  %v343_v22 = vpop.permute.xlu1 %342  ;;  %v341_v25 = vpop.permute.xlu0 %340 }
  0x89   :  { %1211 = vmatmul.mubr.msk.f32.gmra.mxu0 %vm134_vm3, %v133_v8 }
  0x8a   :  { %v347_v31 = vpop.permute.xlu1 %346 }
  0x8b   :  { %v345_v37 = vpop.permute.xlu0 %344 }
  0x8e   :  { %v351_v50 = vpop.permute.xlu1 %350 }
  0x8f   :  { %v349_v57 = vpop.permute.xlu0 %348 }
  0x92   :  { %v355_v5 = vpop.permute.xlu1 %354 }
 0x13d   :  { %v1537_v9 = vpop.f32.mrf.mxu0 }
 0x13e   :  { %v269_v10 = vmax.f32 %v1537_v9, 0.0 }
 0x13f   :  { %v1540_v11 = vpop.f32.mrf.mxu0 }
 0x140   :  { %1249 = vrsqrt.f32 %v269_v10  ;;  %v268_v12 = vmax.f32 %v1540_v11, 0.0  ;;  %vm285_vm4 = vcmp.eq.f32.partialorder %v269_v10, inf  ;;  %v288_v30 = vand.u32 2147483648, %v269_v10 }
 0x141   :  { %v1543_v13 = vpop.f32.mrf.mxu0  ;;  %vm287_vm5 = vcmp.eq.f32.partialorder %v269_v10, 0.0 }
 0x142   :  { %1251 = vrsqrt.f32 %v268_v12  ;;  %v271_v14 = vmax.f32 %v1543_v13, 0.0  ;;  %vm278_vm6 = vcmp.eq.f32.partialorder %v268_v12, inf  ;;  %v281_v36 = vand.u32 2147483648, %v268_v12 }
 0x143   :  { %v1546_v15 = vpop.f32.mrf.mxu0  ;;  %vm280_vm7 = vcmp.eq.f32.partialorder %v268_v12, 0.0 }
 0x144   :  { %1253 = vrsqrt.f32 %v271_v14  ;;  %v270_v16 = vmax.f32 %v1546_v15, 0.0  ;;  %vm299_vm8 = vcmp.eq.f32.partialorder %v271_v14, inf  ;;  %v302_v43 = vand.u32 2147483648, %v271_v14 }
 0x145   :  { %v1549_v17 = vpop.f32.mrf.mxu0  ;;  %vm301_vm9 = vcmp.eq.f32.partialorder %v271_v14, 0.0 }
 0x146   :  { %1255 = vrsqrt.f32 %v270_v16  ;;  %v1552_v18 = vmax.f32 %v1549_v17, 0.0  ;;  %vm292_vm10 = vcmp.eq.f32.partialorder %v270_v16, inf  ;;  %v295_v49 = vand.u32 2147483648, %v270_v16 }
 0x147   :  { %v1554_v19 = vpop.f32.mrf.mxu0  ;;  %vm294_vm11 = vcmp.eq.f32.partialorder %v270_v16, 0.0 }
 0x148   :  { %1257 = vrsqrt.f32 %v1552_v18  ;;  %v1558_v20 = vmax.f32 %v1554_v19, 0.0  ;;  %vm313_vm12 = vcmp.eq.f32.partialorder %v1552_v18, inf  ;;  %v316_v56 = vand.u32 2147483648, %v1552_v18 }
 0x149   :  { %v1560_v21 = vpop.f32.mrf.mxu0  ;;  %vm315_vm13 = vcmp.eq.f32.partialorder %v1552_v18, 0.0 }
 0x14a   :  { %1259 = vrsqrt.f32 %v1558_v20  ;;  %v1564_v23 = vmax.f32 %v1560_v21, 0.0  ;;  %vm306_vm14 = vcmp.eq.f32.partialorder %v1558_v20, inf  ;;  %v309_v63 = vand.u32 2147483648, %v1558_v20 }
 0x14b   :  { %v1566_v24 = vpop.f32.mrf.mxu0  ;;  %vm308_vm15 = vcmp.eq.f32.partialorder %v1558_v20, 0.0 }
 0x14c   :  { %1261 = vrsqrt.f32 %v1564_v23  ;;  %v1570_v26 = vmax.f32 %v1566_v24, 0.0  ;;  %vm327_vm2 = vcmp.eq.f32.partialorder %v1564_v23, inf  ;;  %v330_v6 = vand.u32 2147483648, %v1564_v23 }
 0x14d   :  { %v1250_v27 = vpop.eup %1249  ;;  %vm329_vm3 = vcmp.eq.f32.partialorder %v1564_v23, 0.0 }
 0x14e   :  { %1263 = vrsqrt.f32 %v1570_v26  ;;  %v284_v28 = vmul.f32 %v1250_v27, %v269_v10 }
 0x14f   :  { %v1252_v29 = vpop.eup %1251 }
 0x150   :  { %v286_v32 = vsel %vm285_vm4, %v269_v10, %v284_v28  ;;  %v277_v33 = vmul.f32 %v1252_v29, %v268_v12  ;;  %vm320_vm4 = vcmp.eq.f32.partialorder %v1570_v26, inf  ;;  %v436_v29 = vld [vmem:[%s2026_s8] sm:$0xff] }
 0x151   :  { %v1254_v34 = vpop.eup %1253  ;;  %v289_v35 = vsel %vm287_vm5, %v288_v30, %v286_v32  ;;  %vm322_vm5 = vcmp.eq.f32.partialorder %v1570_v26, 0.0 }
 0x152   :  { %v365_v38 = vmul.f32 %v343_v22, %v289_v35  ;;  %v279_v39 = vsel %vm278_vm6, %v268_v12, %v277_v33  ;;  %v298_v40 = vmul.f32 %v1254_v34, %v271_v14  ;;  %v440_v12 = vld [vmem:[%s2026_s8 + $0x20] sm:$0x1]  ;;  %vm489_vm6 = vcmask 130048  }
 0x153   :  { %v1256_v41 = vpop.eup %1255  ;;  %v282_v42 = vsel %vm280_vm7, %v281_v36, %v279_v39  ;;  %1213 = vmatprep.subr.msk.mxu1 %vm159_vm0, %v440_v12  ;;  %vm506_vm7 = vcmask 269312  }
 0x154   :  { %v364_v44 = vmul.f32 %v341_v25, %v282_v42  ;;  %382 = vrot.lane.b32.xlu1 %v365_v38, %s1299_s1  ;;  %v300_v45 = vsel %vm299_vm8, %v271_v14, %v298_v40  ;;  %v291_v46 = vmul.f32 %v1256_v41, %v270_v16  ;;  %v439_v14 = vld [vmem:[%s2026_s8 + $0x18] sm:$0xff]  ;;  %1214 = vmatpush3.msk.msra.mxu1 %vm159_vm0, %v440_v12  ;;  %v438_v25 = vld [vmem:[%s2026_s8 + $0x10] sm:$0xff] }
 0x155   :  { %v1258_v47 = vpop.eup %1257  ;;  %v303_v48 = vsel %vm301_vm9, %v302_v43, %v300_v45  ;;  %1215 = vmatprep.subr.mxu1 %v439_v14 }
 0x156   :  { %v367_v51 = vmul.f32 %v347_v31, %v303_v48  ;;  %380 = vrot.lane.b32.xlu0 %v364_v44, %s1299_s1  ;;  %v293_v52 = vsel %vm292_vm10, %v270_v16, %v291_v46  ;;  %v312_v53 = vmul.f32 %v1258_v47, %v1552_v18  ;;  %1216 = vmatpush3.msra.mxu1 %v439_v14 }
 0x157   :  { %v1260_v54 = vpop.eup %1259  ;;  %v296_v55 = vsel %vm294_vm11, %v295_v49, %v293_v52  ;;  %1217 = vmatprep.subr.mxu1 %v438_v25 }
 0x158   :  { %v366_v58 = vmul.f32 %v345_v37, %v296_v55  ;;  %386 = vrot.lane.b32.xlu1 %v367_v51, %s1299_s1  ;;  %v314_v59 = vsel %vm313_vm12, %v1552_v18, %v312_v53  ;;  %v305_v60 = vmul.f32 %v1260_v54, %v1558_v20  ;;  %v353_v18 = vpop.permute.xlu0 %352  ;;  %1218 = vmatpush3.msra.mxu1 %v438_v25 }
 0x159   :  { %v1262_v61 = vpop.eup %1261  ;;  %v317_v62 = vsel %vm315_vm13, %v316_v56, %v314_v59  ;;  %v433_v56 = vld [vmem:[%s2027_s5 + $0x28] sm:$0xff] }
 0x15a   :  { %v369_v0 = vmul.f32 %v351_v50, %v317_v62  ;;  %384 = vrot.lane.b32.xlu0 %v366_v58, %s1299_s1  ;;  %v307_v1 = vsel %vm306_vm14, %v1558_v20, %v305_v60  ;;  %v326_v2 = vmul.f32 %v1262_v61, %v1564_v23  ;;  %v323_v20 = vand.u32 2147483648, %v1570_v26  ;;  %v434_v58 = vld [vmem:[%s2027_s5 + $0x30] sm:$0xff]  ;;  %v429_v59 = vld [vmem:[%s2027_s5 + $0x8] sm:$0xff]  ;;  %v435_v60 = vld [vmem:[%s2027_s5 + $0x38] sm:$0xff] }
 0x15b   :  { %v1264_v3 = vpop.eup %1263  ;;  %v310_v4 = vsel %vm308_vm15, %v309_v63, %v307_v1  ;;  %v430_v61 = vld [vmem:[%s2027_s5 + $0x10] sm:$0xff]  ;;  %v421_v62 = vld [vmem:[%s2028_s2 + $0x8] sm:$0xff]  ;;  %v420_v63 = vld [vmem:[%s2028_s2] sm:$0xff] }
 0x15c   :  { %v368_v7 = vmul.f32 %v349_v57, %v310_v4  ;;  %390 = vrot.lane.b32.xlu1 %v369_v0, %s1299_s1  ;;  %v328_v8 = vsel %vm327_vm2, %v1564_v23, %v326_v2  ;;  %v319_v10 = vmul.f32 %v1264_v3, %v1570_v26  ;;  %v428_v57 = vld [vmem:[%s2027_s5] sm:$0xff]  ;;  %v423_v3 = vld [vmem:[%s2028_s2 + $0x18] sm:$0xff]  ;;  %v422_v4 = vld [vmem:[%s2028_s2 + $0x10] sm:$0xff] }
 0x15d   :  { %v331_v16 = vsel %vm329_vm3, %v330_v6, %v328_v8 }
 0x15e   :  { %v371_v22 = vmul.f32 %v355_v5, %v331_v16  ;;  %388 = vrot.lane.b32.xlu0 %v368_v7, %s1299_s1  ;;  %v321_v23 = vsel %vm320_vm4, %v1570_v26, %v319_v10  ;;  %v437_v26 = vld [vmem:[%s2026_s8 + $0x8] sm:$0xff] }
 0x15f   :  { %v324_v27 = vsel %vm322_vm5, %v323_v20, %v321_v23  ;;  %1219 = vmatprep.subr.mxu1 %v437_v26  ;;  %v425_v16 = vld [vmem:[%s2028_s2 + $0x28] sm:$0xff]  ;;  %v424_v20 = vld [vmem:[%s2028_s2 + $0x20] sm:$0xff] }
 0x160   :  { %v370_v28 = vmul.f32 %v353_v18, %v324_v27  ;;  %394 = vrot.lane.b32.xlu1 %v371_v22, %s1299_s1  ;;  %1220 = vmatpush3.msra.mxu1 %v437_v26 }
 0x161   :  { %1221 = vmatprep.subr.mxu1 %v436_v29 }
 0x162   :  { %392 = vrot.lane.b32.xlu0 %v370_v28, %s1299_s1  ;;  %1222 = vmatpush3.msra.mxu1 %v436_v29 }
 0x1c6   :  { %v383_v30 = vpop.permute.xlu1 %382 }
 0x1c7   :  { %v405_v31 = vadd.f32 %v1537_v9, %v383_v30  ;;  %v427_v30 = vld [vmem:[%s2028_s2 + $0x38] sm:$0xff] }
 0x1c8   :  { %v381_v32 = vpop.permute.xlu0 %380 }
 0x1c9   :  { %v413_v33 = vmax.f32 %v405_v31, 0.0  ;;  %v404_v34 = vadd.f32 %v381_v32, %v1540_v11  ;;  %v426_v32 = vld [vmem:[%s2028_s2 + $0x30] sm:$0xff] }
 0x1ca   :  { %v387_v35 = vpop.permute.xlu1 %386 }
 0x1cb   :  { %v450_v36 = vmul.f32 %v413_v33, %v413_v33  ;;  %v412_v37 = vmax.f32 %v404_v34, 0.0  ;;  %v407_v38 = vadd.f32 %v1543_v13, %v387_v35  ;;  %v442_v0 = vmul.f32 %v421_v62, %v413_v33 }
 0x1cc   :  { %v385_v39 = vpop.permute.xlu0 %384 }
 0x1cd   :  { %v449_v40 = vmul.f32 %v412_v37, %v412_v37  ;;  %v415_v41 = vmax.f32 %v407_v38, 0.0  ;;  %v406_v42 = vadd.f32 %v385_v39, %v1546_v15  ;;  %467 = vrot.lane.b32.xlu1 %v450_v36, %s1298_s21  ;;  %v441_v2 = vmul.f32 %v420_v63, %v412_v37 }
 0x1ce   :  { %v391_v43 = vpop.permute.xlu1 %390 }
 0x1cf   :  { %v452_v44 = vmul.f32 %v415_v41, %v415_v41  ;;  %v414_v45 = vmax.f32 %v406_v42, 0.0  ;;  %v409_v9 = vadd.f32 %v1549_v17, %v391_v43  ;;  %465 = vrot.lane.b32.xlu0 %v449_v40, %s1298_s21  ;;  %v444_v8 = vmul.f32 %v423_v3, %v415_v41 }
 0x1d0   :  { %v389_v11 = vpop.permute.xlu0 %388 }
 0x1d1   :  { %v451_v46 = vmul.f32 %v414_v45, %v414_v45  ;;  %v417_v47 = vmax.f32 %v409_v9, 0.0  ;;  %v408_v48 = vadd.f32 %v389_v11, %v1554_v19  ;;  %471 = vrot.lane.b32.xlu1 %v452_v44, %s1298_s21  ;;  %v443_v14 = vmul.f32 %v422_v4, %v414_v45 }
 0x1d2   :  { %v395_v13 = vpop.permute.xlu1 %394 }
 0x1d3   :  { %v454_v49 = vmul.f32 %v417_v47, %v417_v47  ;;  %v416_v50 = vmax.f32 %v408_v48, 0.0  ;;  %v411_v15 = vadd.f32 %v1560_v21, %v395_v13  ;;  %469 = vrot.lane.b32.xlu0 %v451_v46, %s1298_s21  ;;  %v432_v21 = vld [vmem:[%s2027_s5 + $0x20] sm:$0xff]  ;;  %v446_v27 = vmul.f32 %v425_v16, %v417_v47 }
 0x1d4   :  { %v393_v51 = vpop.permute.xlu0 %392 }
 0x1d5   :  { %v453_v52 = vmul.f32 %v416_v50, %v416_v50  ;;  %v1629_v53 = vmax.f32 %v411_v15, 0.0  ;;  %v410_v17 = vadd.f32 %v393_v51, %v1566_v24  ;;  %475 = vrot.lane.b32.xlu1 %v454_v49, %s1298_s21  ;;  %v431_v24 = vld [vmem:[%s2027_s5 + $0x18] sm:$0xff]  ;;  %v445_v29 = vmul.f32 %v424_v20, %v416_v50 }
 0x1d7   :  { %v456_v19 = vmul.f32 %v1629_v53, %v1629_v53  ;;  %v418_v54 = vmax.f32 %v410_v17, 0.0  ;;  %473 = vrot.lane.b32.xlu0 %v453_v52, %s1298_s21  ;;  %v448_v36 = vmul.f32 %v427_v30, %v1629_v53 }
 0x1d9   :  { %v455_v55 = vmul.f32 %v418_v54, %v418_v54  ;;  %479 = vrot.lane.b32.xlu1 %v456_v19, %s1298_s21  ;;  %v447_v39 = vmul.f32 %v426_v32, %v418_v54 }
 0x1db   :  { %477 = vrot.lane.b32.xlu0 %v455_v55, %s1298_s21 }
 0x1dd   :  { %719 = vrot.lane.b32.xlu1 %v432_v21, %s1298_s21 }
 0x1df   :  { %717 = vrot.lane.b32.xlu0 %v431_v24, %s1298_s21 }
 0x1e1   :  { %721 = vrot.lane.b32.xlu1 %v433_v56, %s1298_s21 }
 0x1e3   :  { %711 = vrot.lane.b32.xlu0 %v428_v57, %s1298_s21 }
 0x1e5   :  { %723 = vrot.lane.b32.xlu1 %v434_v58, %s1298_s21 }
 0x1e7   :  { %713 = vrot.lane.b32.xlu0 %v429_v59, %s1298_s21 }
 0x1e9   :  { %725 = vrot.lane.b32.xlu1 %v435_v60, %s1298_s21 }
 0x1eb   :  { %715 = vrot.lane.b32.xlu0 %v430_v61, %s1298_s21 }
 0x23f   :  { %v468_v1 = vpop.permute.xlu1 %467 }
 0x240   :  { %v491_v5 = vsel %vm489_vm6, %v442_v0, %v468_v1 }
 0x241   :  { %v466_v6 = vpop.permute.xlu0 %465  ;;  %v499_v18 = vsel %vm116_vm1, %v491_v5, 1.0 }
 0x242   :  { %v490_v7 = vsel %vm489_vm6, %v441_v2, %v466_v6 }
 0x243   :  { %v472_v10 = vpop.permute.xlu1 %471  ;;  %v498_v12 = vsel %vm116_vm1, %v490_v7, 1.0 }
 0x244   :  { %1223 = vmatprep.mubr.msk.f32.mxu1 %vm506_vm7, %v498_v12  ;;  %v493_v22 = vsel %vm489_vm6, %v444_v8, %v472_v10 }
 0x245   :  { %1224 = vmatmul.mubr.msk.f32.vlgmr.msra.gmra.mxu1 %vm506_vm7, %v499_v18  ;;  %v470_v23 = vpop.permute.xlu0 %469  ;;  %v501_v31 = vsel %vm116_vm1, %v493_v22, 1.0 }
 0x246   :  { %v492_v25 = vsel %vm489_vm6, %v443_v14, %v470_v23 }
 0x247   :  { %v500_v28 = vsel %vm116_vm1, %v492_v25, 1.0  ;;  %v476_v26 = vpop.permute.xlu1 %475 }
 0x248   :  { %1226 = vmatprep.mubr.msk.f32.mxu1 %vm506_vm7, %v500_v28  ;;  %v495_v33 = vsel %vm489_vm6, %v446_v27, %v476_v26 }
 0x249   :  { %1227 = vmatmul.mubr.msk.f32.gmra.mxu1 %vm506_vm7, %v501_v31  ;;  %v474_v34 = vpop.permute.xlu0 %473  ;;  %v503_v40 = vsel %vm116_vm1, %v495_v33, 1.0 }
 0x24a   :  { %v494_v35 = vsel %vm489_vm6, %v445_v29, %v474_v34 }
 0x24b   :  { %v502_v37 = vsel %vm116_vm1, %v494_v35, 1.0  ;;  %v480_v38 = vpop.permute.xlu1 %479 }
 0x24c   :  { %1229 = vmatprep.mubr.msk.f32.mxu1 %vm506_vm7, %v502_v37  ;;  %v497_v41 = vsel %vm489_vm6, %v448_v36, %v480_v38 }
 0x24d   :  { %1230 = vmatmul.mubr.msk.f32.gmra.mxu1 %vm506_vm7, %v503_v40  ;;  %v478_v42 = vpop.permute.xlu0 %477  ;;  %v505_v45 = vsel %vm116_vm1, %v497_v41, 1.0 }
 0x24e   :  { %v496_v43 = vsel %vm489_vm6, %v447_v39, %v478_v42 }
 0x24f   :  { %v504_v44 = vsel %vm116_vm1, %v496_v43, 1.0  ;;  %v720_v61 = vpop.permute.xlu1 %719 }
 0x250   :  { %1232 = vmatprep.mubr.msk.f32.mxu1 %vm506_vm7, %v504_v44 }
 0x251   :  { %1233 = vmatmul.mubr.msk.f32.gmra.mxu1 %vm506_vm7, %v505_v45  ;;  %v718_v24 = vpop.permute.xlu0 %717 }
 0x253   :  { %v722_v22 = vpop.permute.xlu1 %721 }
 0x255   :  { %v712_v5 = vpop.permute.xlu0 %711 }
 0x257   :  { %v724_v43 = vpop.permute.xlu1 %723 }
 0x259   :  { %v714_v31 = vpop.permute.xlu0 %713 }
 0x25d   :  { %v716_v42 = vpop.permute.xlu0 %715 }
 0x305   :  { %v1719_v9 = vpop.f32.mrf.mxu1 }
 0x306   :  { %v1722_v11 = vmax.f32 %v1719_v9, 0.0 }
 0x307   :  { %v1724_v46 = vpop.f32.mrf.mxu1 }
 0x308   :  { %v639_v47 = vmax.f32 %v1724_v46, 0.0  ;;  %vm656_vm12 = vcmp.eq.f32.partialorder %v1722_v11, inf  ;;  %vm658_vm13 = vcmp.eq.f32.partialorder %v1722_v11, 0.0  ;;  %v659_v20 = vand.u32 2147483648, %v1722_v11 }
 0x309   :  { %v1727_v48 = vpop.f32.mrf.mxu1 }
 0x30a   :  { %1265 = vrsqrt.f32 %v639_v47  ;;  %v642_v13 = vmax.f32 %v1727_v48, 0.0  ;;  %vm649_vm9 = vcmp.eq.f32.partialorder %v639_v47, inf  ;;  %v652_v4 = vand.u32 2147483648, %v639_v47 }
 0x30b   :  { %1267 = vrsqrt.f32 %v1722_v11  ;;  %v1731_v49 = vpop.f32.mrf.mxu1  ;;  %vm651_vm11 = vcmp.eq.f32.partialorder %v639_v47, 0.0 }
 0x30c   :  { %1269 = vrsqrt.f32 %v642_v13  ;;  %v1734_v50 = vmax.f32 %v1731_v49, 0.0  ;;  %vm670_vm8 = vcmp.eq.f32.partialorder %v642_v13, inf  ;;  %v673_v60 = vand.u32 2147483648, %v642_v13 }
 0x30d   :  { %v1736_v15 = vpop.f32.mrf.mxu1  ;;  %vm672_vm10 = vcmp.eq.f32.partialorder %v642_v13, 0.0 }
 0x30e   :  { %v1739_v51 = vmax.f32 %v1736_v15, 0.0  ;;  %1271 = vrsqrt.f32 %v1734_v50  ;;  %vm663_vm3 = vcmp.eq.f32.partialorder %v1734_v50, inf  ;;  %v666_v37 = vand.u32 2147483648, %v1734_v50 }
 0x30f   :  { %v1742_v52 = vpop.f32.mrf.mxu1 }
 0x310   :  { %1273 = vrsqrt.f32 %v1739_v51  ;;  %v643_v53 = vmax.f32 %v1742_v52, 0.0  ;;  %vm684_vm15 = vcmp.eq.f32.partialorder %v1739_v51, inf  ;;  %v687_v32 = vand.u32 2147483648, %v1739_v51 }
 0x311   :  { %v1746_v17 = vpop.f32.mrf.mxu1  ;;  %vm686_vm4 = vcmp.eq.f32.partialorder %v1739_v51, 0.0 }
 0x312   :  { %1275 = vrsqrt.f32 %v643_v53  ;;  %v1749_v19 = vmax.f32 %v1746_v17, 0.0  ;;  %vm677_vm14 = vcmp.eq.f32.partialorder %v643_v53, inf  ;;  %v680_v18 = vand.u32 2147483648, %v643_v53 }
 0x313   :  { %v1751_v54 = vpop.f32.mrf.mxu1  ;;  %vm679_vm2 = vcmp.eq.f32.partialorder %v643_v53, 0.0 }
 0x314   :  { %v1754_v55 = vmax.f32 %v1751_v54, 0.0  ;;  %1277 = vrsqrt.f32 %v1749_v19 }
 0x316   :  { %1279 = vrsqrt.f32 %v1754_v55  ;;  %vm691_vm5 = vcmp.eq.f32.partialorder %v1754_v55, inf  ;;  %v694_v44 = vand.u32 2147483648, %v1754_v55 }
 0x317   :  { %v1266_v21 = vpop.eup %1265 }
 0x318   :  { %v1268_v56 = vpop.eup %1267  ;;  %v648_v57 = vmul.f32 %v1266_v21, %v639_v47  ;;  %v814_v21 = vld [vmem:[%s2029_s9 + $0x38] sm:$0xff] }
 0x319   :  { %v1270_v58 = vpop.eup %1269  ;;  %v655_v1 = vmul.f32 %v1268_v56, %v1722_v11 }
 0x31a   :  { %v669_v59 = vmul.f32 %v1270_v58, %v642_v13  ;;  %v650_v0 = vsel %vm649_vm9, %v639_v47, %v648_v57  ;;  %vm693_vm9 = vcmp.eq.f32.partialorder %v1754_v55, 0.0  ;;  %v812_v57 = vld [vmem:[%s2029_s9 + $0x28] sm:$0xff]  ;;  %v811_v58 = vld [vmem:[%s2029_s9 + $0x20] sm:$0xff] }
 0x31b   :  { %v1272_v62 = vpop.eup %1271  ;;  %v653_v10 = vsel %vm651_vm11, %v652_v4, %v650_v0  ;;  %v657_v14 = vsel %vm656_vm12, %v1722_v11, %v655_v1  ;;  %vm700_vm11 = vcmp.eq.f32.partialorder %v1749_v19, 0.0  ;;  %v1300_v0 = vmov 0.0  }
 0x31c   :  { %v671_v63 = vsel %vm670_vm8, %v642_v13, %v669_v59  ;;  %v662_v16 = vmul.f32 %v1272_v62, %v1734_v50  ;;  %v735_v25 = vmul.f32 %v712_v5, %v653_v10  ;;  %v660_v30 = vsel %vm658_vm13, %v659_v20, %v657_v14  ;;  %v808_v62 = vld [vmem:[%s2029_s9 + $0x8] sm:$0xff]  ;;  %993 = vmatprep.mubr.f32.mxu1 %v1300_v0 }
 0x31d   :  { %v1274_v2 = vpop.eup %1273  ;;  %v674_v3 = vsel %vm672_vm10, %v673_v60, %v671_v63  ;;  %v736_v38 = vmul.f32 %v714_v31, %v660_v30  ;;  %vm665_vm8 = vcmp.eq.f32.partialorder %v1734_v50, 0.0  ;;  %vm698_vm10 = vcmp.eq.f32.partialorder %v1749_v19, inf  ;;  %v810_v60 = vld [vmem:[%s2029_s9 + $0x18] sm:$0xff]  ;;  %v807_v63 = vld [vmem:[%s2029_s9] sm:$0xff]  ;;  %975 = vmatprep.mubr.f32.mxu0 %v1300_v0 }
 0x31e   :  { %v738_v6 = vmul.f32 %v718_v24, %v674_v3  ;;  %v683_v7 = vmul.f32 %v1274_v2, %v1739_v51  ;;  %v664_v34 = vsel %vm663_vm3, %v1734_v50, %v662_v16  ;;  %v701_v50 = vand.u32 2147483648, %v1749_v19  ;;  %v726_v24 = vpop.permute.xlu1 %725 }
 0x31f   :  { %v1276_v8 = vpop.eup %1275  ;;  %v667_v41 = vsel %vm665_vm8, %v666_v37, %v664_v34 }
 0x320   :  { %v676_v12 = vmul.f32 %v1276_v8, %v643_v53  ;;  %757 = vrot.lane.b32.xlu0 %v738_v6, %s1299_s1  ;;  %v685_v28 = vsel %vm684_vm15, %v1739_v51, %v683_v7  ;;  %v737_v47 = vmul.f32 %v716_v42, %v667_v41  ;;  %v792_v41 = vld [vmem:[%s2030_s3 + $0x8] sm:$0xff] }
 0x321   :  { %v1278_v23 = vpop.eup %1277  ;;  %v688_v36 = vsel %vm686_vm4, %v687_v32, %v685_v28 }
 0x322   :  { %v678_v27 = vsel %vm677_vm14, %v643_v53, %v676_v12  ;;  %v697_v40 = vmul.f32 %v1278_v23, %v1749_v19  ;;  %v740_v45 = vmul.f32 %v722_v22, %v688_v36  ;;  %v816_v53 = vld [vmem:[%s2029_s9 + $0x48] sm:$0x1]  ;;  %v791_v36 = vld [vmem:[%s2030_s3] sm:$0xff] }
 0x323   :  { %v1280_v26 = vpop.eup %1279  ;;  %v681_v29 = vsel %vm679_vm2, %v680_v18, %v678_v27  ;;  %1235 = vmatprep.subr.msk.mxu1 %vm159_vm0, %v816_v53  ;;  %1143 = vmatprep.subr.msk.mxu0 %vm159_vm0, %v816_v53 }
 0x324   :  { %v739_v33 = vmul.f32 %v720_v61, %v681_v29  ;;  %v690_v35 = vmul.f32 %v1280_v26, %v1754_v55  ;;  %751 = vrot.lane.b32.xlu0 %v735_v25, %s1299_s1  ;;  %v699_v13 = vsel %vm698_vm10, %v1749_v19, %v697_v40  ;;  %v813_v19 = vld [vmem:[%s2029_s9 + $0x30] sm:$0xff] }
 0x325   :  { %v702_v56 = vsel %vm700_vm11, %v701_v50, %v699_v13  ;;  %v809_v61 = vld [vmem:[%s2029_s9 + $0x10] sm:$0xff] }
 0x326   :  { %v692_v39 = vsel %vm691_vm5, %v1754_v55, %v690_v35  ;;  %759 = vrot.lane.b32.xlu1 %v739_v33, %s1299_s1  ;;  %v815_v55 = vld [vmem:[%s2029_s9 + $0x40] sm:$0x1]  ;;  %v742_v59 = vmul.f32 %v726_v24, %v702_v56  ;;  %v797_v56 = vld [vmem:[%s2030_s3 + $0x30] sm:$0xff] }
 0x327   :  { %v695_v11 = vsel %vm693_vm9, %v694_v44, %v692_v39  ;;  %1240 = vmatpush1.msk.msra.mxu1 %vm159_vm0, %v815_v55  ;;  %1144 = vmatpush1.msk.msra.mxu0 %vm159_vm0, %v815_v55  ;;  %vm1032_vm0 = vcmask 31744  }
 0x328   :  { %753 = vrot.lane.b32.xlu0 %v736_v38, %s1299_s1  ;;  %v741_v51 = vmul.f32 %v724_v43, %v695_v11  ;;  %1236 = vmatprep.subr.mxu1 %v814_v21  ;;  %v795_v38 = vld [vmem:[%s2030_s3 + $0x20] sm:$0xff] }
 0x329   :  { %1241 = vmatpush1.msra.mxu1 %v813_v19  ;;  %935 = vmatprep.subr.mxu0 %v814_v21 }
 0x32a   :  { %761 = vrot.lane.b32.xlu1 %v740_v45, %s1299_s1  ;;  %1237 = vmatprep.subr.mxu1 %v812_v57  ;;  %v796_v45 = vld [vmem:[%s2030_s3 + $0x28] sm:$0xff] }
 0x32b   :  { %936 = vmatpush1.msra.mxu0 %v813_v19  ;;  %1242 = vmatpush1.msra.mxu1 %v811_v58 }
 0x32c   :  { %755 = vrot.lane.b32.xlu0 %v737_v47, %s1299_s1  ;;  %1238 = vmatprep.subr.mxu1 %v810_v60 }
 0x32d   :  { %937 = vmatprep.subr.mxu0 %v812_v57  ;;  %1243 = vmatpush1.msra.mxu1 %v809_v61 }
 0x32e   :  { %763 = vrot.lane.b32.xlu1 %v741_v51, %s1299_s1  ;;  %938 = vmatpush1.msra.mxu0 %v811_v58  ;;  %v793_v51 = vld [vmem:[%s2030_s3 + $0x10] sm:$0xff] }
 0x32f   :  { %939 = vmatprep.subr.mxu0 %v810_v60  ;;  %1239 = vmatprep.subr.mxu1 %v808_v62 }
 0x330   :  { %940 = vmatpush1.msra.mxu0 %v809_v61  ;;  %1244 = vmatpush1.msra.mxu1 %v807_v63 }
 0x331   :  { %941 = vmatprep.subr.mxu0 %v808_v62 }
 0x332   :  { %765 = vrot.lane.b32.xlu1 %v742_v59, %s1299_s1  ;;  %942 = vmatpush1.msra.mxu0 %v807_v63 }
 0x392   :  { %v758_v1 = vpop.permute.xlu0 %757 }
 0x393   :  { %v778_v2 = vadd.f32 %v1727_v48, %v758_v1  ;;  %v798_v1 = vld [vmem:[%s2030_s3 + $0x38] sm:$0xff] }
 0x395   :  { %v786_v3 = vmax.f32 %v778_v2, 0.0 }
 0x396   :  { %v752_v4 = vpop.permute.xlu0 %751 }
 0x397   :  { %v828_v5 = vmul.f32 %v786_v3, %v786_v3  ;;  %v775_v6 = vadd.f32 %v752_v4, %v1724_v46 }
 0x398   :  { %v760_v7 = vpop.permute.xlu1 %759 }
 0x399   :  { %v783_v8 = vmax.f32 %v775_v6, 0.0  ;;  %v779_v10 = vadd.f32 %v760_v7, %v1742_v52  ;;  %847 = vrot.lane.b32.xlu0 %v828_v5, %s1298_s21 }
 0x39a   :  { %v754_v12 = vpop.permute.xlu0 %753 }
 0x39b   :  { %v825_v14 = vmul.f32 %v783_v8, %v783_v8  ;;  %v787_v16 = vmax.f32 %v779_v10, 0.0  ;;  %v776_v18 = vadd.f32 %v1719_v9, %v754_v12  ;;  %v817_v40 = vmul.f32 %v791_v36, %v783_v8 }
 0x39c   :  { %v762_v20 = vpop.permute.xlu1 %761 }
 0x39d   :  { %v829_v22 = vmul.f32 %v787_v16, %v787_v16  ;;  %v784_v23 = vmax.f32 %v776_v18, 0.0  ;;  %v780_v48 = vadd.f32 %v1736_v15, %v762_v20  ;;  %841 = vrot.lane.b32.xlu0 %v825_v14, %s1298_s21  ;;  %v821_v43 = vmul.f32 %v795_v38, %v787_v16  ;;  %v799_v38 = vld [vmem:[%s2031_s6] sm:$0xff] }
 0x39e   :  { %v756_v25 = vpop.permute.xlu0 %755 }
 0x39f   :  { %v826_v46 = vmul.f32 %v784_v23, %v784_v23  ;;  %v788_v27 = vmax.f32 %v780_v48, 0.0  ;;  %v777_v28 = vadd.f32 %v756_v25, %v1731_v49  ;;  %849 = vrot.lane.b32.xlu1 %v829_v22, %s1298_s21  ;;  %v818_v13 = vmul.f32 %v792_v41, %v784_v23 }
 0x3a0   :  { %v764_v52 = vpop.permute.xlu1 %763 }
 0x3a1   :  { %v830_v26 = vmul.f32 %v788_v27, %v788_v27  ;;  %v785_v29 = vmax.f32 %v777_v28, 0.0  ;;  %v781_v30 = vadd.f32 %v764_v52, %v1751_v54  ;;  %843 = vrot.lane.b32.xlu0 %v826_v46, %s1298_s21  ;;  %v794_v54 = vld [vmem:[%s2030_s3 + $0x18] sm:$0xff]  ;;  %v822_v21 = vmul.f32 %v796_v45, %v788_v27 }
 0x3a2   :  { %v820_v35 = vmul.f32 %v794_v54, %v786_v3 }
 0x3a3   :  { %v827_v9 = vmul.f32 %v785_v29, %v785_v29  ;;  %v789_v31 = vmax.f32 %v781_v30, 0.0  ;;  %851 = vrot.lane.b32.xlu1 %v830_v26, %s1298_s21  ;;  %v819_v58 = vmul.f32 %v793_v51, %v785_v29 }
 0x3a4   :  { %v766_v15 = vpop.permute.xlu1 %765 }
 0x3a5   :  { %v831_v32 = vmul.f32 %v789_v31, %v789_v31  ;;  %v782_v33 = vadd.f32 %v1746_v17, %v766_v15  ;;  %845 = vrot.lane.b32.xlu0 %v827_v9, %s1298_s21  ;;  %v823_v62 = vmul.f32 %v797_v56, %v789_v31 }
 0x3a7   :  { %v790_v49 = vmax.f32 %v782_v33, 0.0  ;;  %853 = vrot.lane.b32.xlu1 %v831_v32, %s1298_s21  ;;  %v802_v32 = vld [vmem:[%s2031_s6 + $0x18] sm:$0xff] }
 0x3a9   :  { %v832_v34 = vmul.f32 %v790_v49, %v790_v49  ;;  %v824_v6 = vmul.f32 %v798_v1, %v790_v49 }
 0x3ab   :  { %855 = vrot.lane.b32.xlu1 %v832_v34, %s1298_s21 }
 0x40b   :  { %v848_v37 = vpop.permute.xlu0 %847 }
 0x40c   :  { %v868_v17 = vsel %vm489_vm6, %v820_v35, %v848_v37  ;;  %v1036_v35 = vsel %vm1032_vm0, %v802_v32, 0.0 }
 0x40d   :  { %v876_v39 = vsel %vm116_vm1, %v868_v17, 1.0 }
 0x40e   :  { %1148 = vmatmul.mubr.msk.f32.vlgmr.msra.gmra.mxu1 %vm506_vm7, %v876_v39  ;;  %v803_v39 = vld [vmem:[%s2031_s6 + $0x20] sm:$0xff] }
 0x40f   :  { %v842_v42 = vpop.permute.xlu0 %841  ;;  %999 = vmatprep.mubr.f32.mxu1 %v1300_v0  ;;  %v1037_v51 = vsel %vm1032_vm0, %v803_v39, 0.0 }
 0x410   :  { %v865_v44 = vsel %vm489_vm6, %v817_v40, %v842_v42 }
 0x411   :  { %v873_v11 = vsel %vm116_vm1, %v865_v44, 1.0  ;;  %v850_v47 = vpop.permute.xlu1 %849 }
 0x412   :  { %v869_v50 = vsel %vm489_vm6, %v821_v43, %v850_v47  ;;  %1145 = vmatmul.mubr.msk.f32.vlgmr.msra.gmra.mxu0 %vm506_vm7, %v873_v11  ;;  %v800_v43 = vld [vmem:[%s2031_s6 + $0x8] sm:$0xff]  ;;  %v801_v47 = vld [vmem:[%s2031_s6 + $0x10] sm:$0xff] }
 0x413   :  { %v877_v53 = vsel %vm116_vm1, %v869_v50, 1.0  ;;  %v844_v55 = vpop.permute.xlu0 %843  ;;  %981 = vmatprep.mubr.f32.mxu0 %v1300_v0  ;;  %v804_v11 = vld [vmem:[%s2031_s6 + $0x28] sm:$0xff] }
 0x414   :  { %v866_v24 = vsel %vm489_vm6, %v818_v13, %v844_v55  ;;  %1149 = vmatmul.mubr.msk.f32.gmra.mxu1 %vm506_vm7, %v877_v53  ;;  %v1033_v13 = vsel %vm1032_vm0, %v799_v38, 0.0 }
 0x415   :  { %v874_v19 = vsel %vm116_vm1, %v866_v24, 1.0  ;;  %v852_v57 = vpop.permute.xlu1 %851  ;;  %1005 = vmatprep.mubr.f32.mxu1 %v1300_v0  ;;  %v1034_v24 = vsel %vm1032_vm0, %v800_v43, 0.0 }
 0x416   :  { %v870_v59 = vsel %vm489_vm6, %v822_v21, %v852_v57  ;;  %1146 = vmatmul.mubr.msk.f32.gmra.mxu0 %vm506_vm7, %v874_v19 }
 0x417   :  { %v878_v60 = vsel %vm116_vm1, %v870_v59, 1.0  ;;  %v846_v61 = vpop.permute.xlu0 %845  ;;  %987 = vmatprep.mubr.f32.mxu0 %v1300_v0  ;;  %v1035_v59 = vsel %vm1032_vm0, %v801_v47, 0.0 }
 0x418   :  { %v867_v63 = vsel %vm489_vm6, %v819_v58, %v846_v61  ;;  %1150 = vmatmul.mubr.msk.f32.gmra.mxu1 %vm506_vm7, %v878_v60  ;;  %v1038_v58 = vsel %vm1032_vm0, %v804_v11, 0.0 }
 0x419   :  { %v875_v2 = vsel %vm116_vm1, %v867_v63, 1.0  ;;  %v854_v3 = vpop.permute.xlu1 %853  ;;  %1011 = vmatprep.mubr.f32.mxu1 %v1300_v0 }
 0x41a   :  { %v871_v4 = vsel %vm489_vm6, %v823_v62, %v854_v3  ;;  %1147 = vmatmul.mubr.msk.f32.gmra.mxu0 %vm506_vm7, %v875_v2 }
 0x41b   :  { %v879_v5 = vsel %vm116_vm1, %v871_v4, 1.0 }
 0x41c   :  { %1151 = vmatmul.mubr.msk.f32.gmra.mxu1 %vm506_vm7, %v879_v5 }
 0x41d   :  { %v856_v7 = vpop.permute.xlu1 %855  ;;  %1017 = vmatprep.mubr.f32.mxu1 %v1300_v0 }
 0x41e   :  { %v872_v8 = vsel %vm489_vm6, %v824_v6, %v856_v7 }
 0x41f   :  { %v880_v10 = vsel %vm116_vm1, %v872_v8, 1.0 }
 0x420   :  { %1152 = vmatmul.mubr.msk.f32.gmra.mxu1 %vm506_vm7, %v880_v10 }
 0x4ce   :  { %v995_v12 = vpop.f32.mrf.mxu1 }
 0x4d0   :  { %v997_v14 = vpop.f32.mrf.mxu1 }
 0x4d1   :  { %v1027_v16 = vmax.f32 %v997_v14, 0.0 }
 0x4d2   :  { %v1897_v18 = vpop.f32.mrf.mxu0 }
 0x4d3   :  { %1281 = vrsqrt.f32 %v1027_v16  ;;  %vm1064_vm1 = vcmp.eq.f32.partialorder %v1027_v16, inf  ;;  %v1067_v36 = vand.u32 2147483648, %v1027_v16  ;;  %vm1066_vm6 = vcmp.eq.f32.partialorder %v1027_v16, 0.0 }
 0x4d4   :  { %v979_v20 = vpop.f32.mrf.mxu0  ;;  %v1899_v22 = vpop.f32.mrf.mxu1 }
 0x4d5   :  { %v1024_v23 = vmax.f32 %v979_v20, 0.0 }
 0x4d6   :  { %v1901_v48 = vpop.f32.mrf.mxu0  ;;  %v1003_v25 = vpop.f32.mrf.mxu1 }
 0x4d7   :  { %1283 = vrsqrt.f32 %v1024_v23  ;;  %v1903_v0 = vmax.f32 %v1003_v25, 0.0  ;;  %vm1043_vm7 = vcmp.eq.f32.partialorder %v1024_v23, inf  ;;  %v1046_v50 = vand.u32 2147483648, %v1024_v23  ;;  %v805_v25 = vld [vmem:[%s2031_s6 + $0x30] sm:$0xff] }
 0x4d8   :  { %v985_v46 = vpop.f32.mrf.mxu0  ;;  %v1905_v27 = vpop.f32.mrf.mxu1  ;;  %vm1045_vm12 = vcmp.eq.f32.partialorder %v1024_v23, 0.0 }
 0x4d9   :  { %v1907_v28 = vmax.f32 %v985_v46, 0.0  ;;  %1285 = vrsqrt.f32 %v1903_v0  ;;  %vm1071_vm13 = vcmp.eq.f32.partialorder %v1903_v0, inf  ;;  %v1074_v61 = vand.u32 2147483648, %v1903_v0 }
 0x4da   :  { %v1910_v52 = vpop.f32.mrf.mxu0  ;;  %v1009_v26 = vpop.f32.mrf.mxu1  ;;  %vm1073_vm14 = vcmp.eq.f32.partialorder %v1903_v0, 0.0 }
 0x4db   :  { %1287 = vrsqrt.f32 %v1907_v28  ;;  %v1913_v29 = vmax.f32 %v1009_v26, 0.0  ;;  %vm1050_vm15 = vcmp.eq.f32.partialorder %v1907_v28, inf  ;;  %v1053_v1 = vand.u32 2147483648, %v1907_v28 }
 0x4dc   :  { %v991_v30 = vpop.f32.mrf.mxu0  ;;  %v1915_v9 = vpop.f32.mrf.mxu1  ;;  %vm1052_vm2 = vcmp.eq.f32.partialorder %v1907_v28, 0.0 }
 0x4dd   :  { %v1917_v31 = vmax.f32 %v991_v30, 0.0  ;;  %1289 = vrsqrt.f32 %v1913_v29  ;;  %vm1078_vm3 = vcmp.eq.f32.partialorder %v1913_v29, inf  ;;  %vm1080_vm4 = vcmp.eq.f32.partialorder %v1913_v29, 0.0 }
 0x4de   :  { %v1015_v15 = vpop.f32.mrf.mxu1  ;;  %v1081_v14 = vand.u32 2147483648, %v1913_v29 }
 0x4df   :  { %1291 = vrsqrt.f32 %v1917_v31  ;;  %v1924_v49 = vmax.f32 %v1015_v15, 0.0  ;;  %vm1057_vm5 = vcmp.eq.f32.partialorder %v1917_v31, inf  ;;  %vm1059_vm8 = vcmp.eq.f32.partialorder %v1917_v31, 0.0 }
 0x4e0   :  { %v1282_v33 = vpop.eup %1281  ;;  %v1926_v34 = vpop.f32.mrf.mxu1 }
 0x4e1   :  { %v1063_v54 = vmul.f32 %v1282_v33, %v1027_v16  ;;  %1293 = vrsqrt.f32 %v1924_v49  ;;  %vm1085_vm9 = vcmp.eq.f32.partialorder %v1924_v49, inf  ;;  %v1088_v32 = vand.u32 2147483648, %v1924_v49 }
 0x4e2   :  { %v1021_v37 = vpop.f32.mrf.mxu1  ;;  %vm1087_vm10 = vcmp.eq.f32.partialorder %v1924_v49, 0.0 }
 0x4e3   :  { %v1065_v17 = vsel %vm1064_vm1, %v1027_v16, %v1063_v54  ;;  %v1936_v40 = vmax.f32 %v1021_v37, 0.0 }
 0x4e4   :  { %v1284_v41 = vpop.eup %1283  ;;  %v1068_v42 = vsel %vm1066_vm6, %v1067_v36, %v1065_v17 }
 0x4e5   :  { %v1100_v44 = vmul.f32 %v1068_v42, %v1036_v35  ;;  %v1042_v45 = vmul.f32 %v1284_v41, %v1024_v23  ;;  %1295 = vrsqrt.f32 %v1936_v40  ;;  %vm1092_vm11 = vcmp.eq.f32.partialorder %v1936_v40, inf }
 0x4e6   :  { %v1286_v53 = vpop.eup %1285  ;;  %vm1094_vm1 = vcmp.eq.f32.partialorder %v1936_v40, 0.0 }
 0x4e7   :  { %v1108_v55 = vadd.f32 %v1100_v44, %v995_v12  ;;  %v1044_v21 = vsel %vm1043_vm7, %v1024_v23, %v1042_v45  ;;  %v1070_v57 = vmul.f32 %v1286_v53, %v1903_v0  ;;  %v1060_v23 = vand.u32 2147483648, %v1917_v31 }
 0x4e8   :  { %v1288_v56 = vpop.eup %1287  ;;  %v1047_v19 = vsel %vm1045_vm12, %v1046_v50, %v1044_v21 }
 0x4e9   :  { %1116 = vst [vmem:[%s2032_s10 + $0x18] sm:$0xff] %v1108_v55  ;;  %v1097_v60 = vmul.f32 %v1047_v19, %v1033_v13  ;;  %v1049_v62 = vmul.f32 %v1288_v56, %v1907_v28  ;;  %v1072_v63 = vsel %vm1071_vm13, %v1903_v0, %v1070_v57 }
 0x4ea   :  { %v1290_v2 = vpop.eup %1289  ;;  %v1075_v4 = vsel %vm1073_vm14, %v1074_v61, %v1072_v63 }
 0x4eb   :  { %v1105_v3 = vadd.f32 %v1097_v60, %v1897_v18  ;;  %v1051_v5 = vsel %vm1050_vm15, %v1907_v28, %v1049_v62  ;;  %v1101_v7 = vmul.f32 %v1075_v4, %v1037_v51  ;;  %v1077_v10 = vmul.f32 %v1290_v2, %v1913_v29 }
 0x4ec   :  { %v1292_v6 = vpop.eup %1291  ;;  %v1054_v8 = vsel %vm1052_vm2, %v1053_v1, %v1051_v5 }
 0x4ed   :  { %1113 = vst [vmem:[%s2032_s10] sm:$0xff] %v1105_v3  ;;  %v1098_v12 = vmul.f32 %v1054_v8, %v1034_v24  ;;  %v1056_v16 = vmul.f32 %v1292_v6, %v1917_v31  ;;  %v1109_v18 = vadd.f32 %v1101_v7, %v1899_v22  ;;  %v1079_v20 = vsel %vm1078_vm3, %v1913_v29, %v1077_v10 }
 0x4ee   :  { %v1294_v0 = vpop.eup %1293  ;;  %v1082_v28 = vsel %vm1080_vm4, %v1081_v14, %v1079_v20 }
 0x4ef   :  { %v1106_v46 = vadd.f32 %v1098_v12, %v1901_v48  ;;  %v1058_v26 = vsel %vm1057_vm5, %v1917_v31, %v1056_v16  ;;  %1117 = vst [vmem:[%s2032_s10 + $0x20] sm:$0xff] %v1109_v18  ;;  %v1102_v22 = vmul.f32 %v1082_v28, %v1038_v58  ;;  %v1084_v30 = vmul.f32 %v1294_v0, %v1924_v49  ;;  %v806_v31 = vld [vmem:[%s2031_s6 + $0x38] sm:$0xff] }
 0x4f0   :  { %v1061_v29 = vsel %vm1059_vm8, %v1060_v23, %v1058_v26  ;;  %v1039_v48 = vsel %vm1032_vm0, %v805_v25, 0.0  ;;  %v1040_v39 = vsel %vm1032_vm0, %v806_v31, 0.0 }
 0x4f1   :  { %1114 = vst [vmem:[%s2032_s10 + $0x8] sm:$0xff] %v1106_v46  ;;  %v1099_v15 = vmul.f32 %v1061_v29, %v1035_v59  ;;  %v1110_v54 = vadd.f32 %v1102_v22, %v1905_v27  ;;  %v1086_v35 = vsel %vm1085_vm9, %v1924_v49, %v1084_v30  ;;  %v1095_v27 = vand.u32 2147483648, %v1936_v40 }
 0x4f2   :  { %v1296_v33 = vpop.eup %1295  ;;  %v1089_v37 = vsel %vm1087_vm10, %v1088_v32, %v1086_v35 }
 0x4f3   :  { %v1107_v36 = vadd.f32 %v1099_v15, %v1910_v52  ;;  %v1091_v17 = vmul.f32 %v1296_v33, %v1936_v40  ;;  %1118 = vst [vmem:[%s2032_s10 + $0x28] sm:$0xff] %v1110_v54  ;;  %v1103_v38 = vmul.f32 %v1089_v37, %v1039_v48 }
 0x4f5   :  { %1115 = vst [vmem:[%s2032_s10 + $0x10] sm:$0xff] %v1107_v36  ;;  %v1093_v52 = vsel %vm1092_vm11, %v1936_v40, %v1091_v17  ;;  %v1111_v49 = vadd.f32 %v1103_v38, %v1915_v9 }
 0x4f6   :  { %v1096_v41 = vsel %vm1094_vm1, %v1095_v27, %v1093_v52 }
 0x4f7   :  { %v1104_v42 = vmul.f32 %v1096_v41, %v1040_v39  ;;  %1119 = vst [vmem:[%s2032_s10 + $0x30] sm:$0xff] %v1111_v49 }
 0x4f9   :  { %v1112_v43 = vadd.f32 %v1104_v42, %v1926_v34 }
 0x4fb   :  { %1120 = vst [vmem:[%s2032_s10 + $0x38] sm:$0xff] %v1112_v43 }

</bundles_post_ra>
